<compile_context>
chip_gen: v7x
topology: tpu7x:2x2x1
jax: 0.10.0
libtpu: 0.0.40
codegen_flags: <defaults>
</compile_context>

<pallas_src>
import functools

import jax
import jax.numpy as jnp
from jax.experimental import pallas as pl
from jax.experimental.pallas import tpu as pltpu

_EPS = 1e-5
_LANES = 128
_SUBLANES = 8


def _make_dice_kernel(*, logits: bool, n_valid: int, bs: int, cps: int,
                      needs_mask: bool):
    """grid = (split, row, chunk). Accumulates intersection and sum(o)+sum(t)."""

    def kernel(o_ref, t_ref, inter_ref, tot_ref):
        s = pl.program_id(0)   # reduction split (parallel; one per TC on v7x)
        k = pl.program_id(2)   # chunk within this split (reduction axis)

        @pl.when(k == 0)
        def _init():
            inter_ref[...] = jnp.zeros_like(inter_ref)
            tot_ref[...] = jnp.zeros_like(tot_ref)

        # Cast in-kernel; inputs stay in native dtype in HBM.
        o = o_ref[0].astype(jnp.float32)
        t = t_ref[0].astype(jnp.float32)
        if logits:
            o = jax.nn.sigmoid(o)

        def accum(ov, tv):
            # Fold (bs,128) -> (8,128) with element-wise VPU adds only, then
            # accumulate into the VMEM-resident output block. The cross-lane
            # reduction happens once, outside the kernel.
            inter_p = jnp.sum(
                (ov * tv).reshape(bs // _SUBLANES, _SUBLANES, _LANES), axis=0)
            tot_p = jnp.sum(
                (ov + tv).reshape(bs // _SUBLANES, _SUBLANES, _LANES), axis=0)
            inter_ref[0, 0] += inter_p
            tot_ref[0, 0] += tot_p

        if needs_mask:
            # Global chunk this program handles (may run past the real chunk
            # count when chunks don't divide evenly across splits; the mask
            # then zeroes the whole contribution of the re-read block).
            chunk = s * cps + k
            base = chunk * (bs * _LANES)
            full = (base + bs * _LANES) <= n_valid

            @pl.when(full)
            def _interior():           # common path: no mask work
                accum(o, t)

            @pl.when(jnp.logical_not(full))
            def _tail():               # tail / clamped chunk: mask invalid
                sub = jax.lax.broadcasted_iota(jnp.int32, (bs, _LANES), 0)
                lane = jax.lax.broadcasted_iota(jnp.int32, (bs, _LANES), 1)
                valid = (base + sub * _LANES + lane) < n_valid
                accum(jnp.where(valid, o, 0.0), jnp.where(valid, t, 0.0))
        else:
            accum(o, t)

    return kernel


@functools.partial(
    jax.jit,
    static_argnames=("per_image", "logits", "block_sublanes", "num_splits"))
def dice_loss(outputs, targets, *, per_image=False, logits=False,
              block_sublanes=None, num_splits=2):
    """Equivalent of TorchDiceLoss(per_image=per_image, logits=logits)(outputs, targets)."""
    eps = _EPS
    batch = outputs.shape[0]
    rows = batch if per_image else 1

    o = outputs.reshape(rows, -1)          # native dtype, no wrapper cast
    t = targets.reshape(rows, -1)
    n = o.shape[1]

    # Present each row as a sublane-dense (S, 128) slab. A pad copy is only
    # needed when n is not a multiple of 128 (or the slab would be shorter
    # than one 8-sublane block); pad values are irrelevant (masked in-kernel).
    s_rows = max(pl.cdiv(n, _LANES), _SUBLANES)
    n_pad = s_rows * _LANES
    if n_pad != n:
        o = jnp.pad(o, ((0, 0), (0, n_pad - n)))
        t = jnp.pad(t, ((0, 0), (0, n_pad - n)))
    o3 = o.reshape(rows, s_rows, _LANES)
    t3 = t.reshape(rows, s_rows, _LANES)

    # Block sizing: ~1 MiB of f32 work per input block (f32 cast + temporaries
    # happen in-kernel), so 2 inputs x 2 pipeline buffers + intermediates stay
    # comfortably inside the scoped VMEM budget on v5e / v6e / v7x.
    if block_sublanes is None:
        block_sublanes = (1 << 20) // (_LANES * 4)          # 2048 sublanes
    block_sublanes = max(_SUBLANES, (block_sublanes // _SUBLANES) * _SUBLANES)
    # Keep bs a multiple of 8 and <= s_rows (s_rows >= 8 by construction);
    # a ragged last block is handled by the in-kernel mask.
    bs = max(_SUBLANES, min(block_sublanes, (s_rows // _SUBLANES) * _SUBLANES))
    nct = pl.cdiv(s_rows, bs)              # chunks per image row
    ns = max(1, min(num_splits, nct))      # reduction splits (2 TCs on v7x)
    cps = pl.cdiv(nct, ns)                 # chunks per split

    needs_mask = (n != n_pad) or (nct * bs != s_rows) or (ns * cps != nct)
    kernel = _make_dice_kernel(logits=logits, n_valid=n, bs=bs, cps=cps,
                               needs_mask=needs_mask)

    def in_map(s, b, k):
        # Clamp keeps the DMA in-bounds for the (rare) extra chunks of the
        # last split; their contribution is zeroed by the in-kernel mask.
        return (b, jnp.minimum(s * cps + k, nct - 1), 0)

    def out_map(s, b, k):
        return (s, b, 0, 0)

    inter, tot = pl.pallas_call(
        kernel,
        out_shape=(
            jax.ShapeDtypeStruct((ns, rows, _SUBLANES, _LANES), jnp.float32),
            jax.ShapeDtypeStruct((ns, rows, _SUBLANES, _LANES), jnp.float32),
        ),
        grid_spec=pltpu.PrefetchScalarGridSpec(
            num_scalar_prefetch=0,
            grid=(ns, rows, cps),
            in_specs=[
                pl.BlockSpec((1, bs, _LANES), in_map),
                pl.BlockSpec((1, bs, _LANES), in_map),
            ],
            out_specs=(
                pl.BlockSpec((1, 1, _SUBLANES, _LANES), out_map),
                pl.BlockSpec((1, 1, _SUBLANES, _LANES), out_map),
            ),
        ),
        compiler_params=pltpu.CompilerParams(
            dimension_semantics=("parallel", "parallel", "arbitrary"),
            vmem_limit_bytes=32 * 1024 * 1024,
        ),
    )(o3, t3)

    # Final cross-lane reduction + dice math (tiny arrays) in plain JAX.
    inter_row = jnp.sum(inter, axis=(0, 2, 3))        # (rows,)
    tot_row = jnp.sum(tot, axis=(0, 2, 3))            # (rows,) = sum(o)+sum(t)
    loss = 1.0 - (2.0 * inter_row + eps) / (tot_row + eps)
    return jnp.mean(loss)


def _reference_dice_loss(outputs, targets, *, per_image=False, logits=False):
    eps = _EPS
    if logits:
        outputs = jax.nn.sigmoid(outputs)
    rows = outputs.shape[0] if per_image else 1
    o = outputs.reshape(rows, -1).astype(jnp.float32)
    t = targets.reshape(rows, -1).astype(jnp.float32)
    inter = jnp.sum(o * t, axis=1)
    union = jnp.sum(o, axis=1) + jnp.sum(t, axis=1) + eps
    return jnp.mean(1.0 - (2.0 * inter + eps) / union)


if __name__ == "__main__":
    key = jax.random.PRNGKey(0)
    k_out, k_tgt = jax.random.split(key)

    ok = True

    # Small NCHW shapes consistent with a segmentation head (aligned case).
    B, C, H, W = 2, 4, 16, 16
    outputs = jax.random.uniform(k_out, (B, C, H, W), dtype=jnp.float32)           # probabilities
    targets = (jax.random.uniform(k_tgt, (B, C, H, W)) > 0.5).astype(jnp.float32)  # binary mask
    for per_image in (False, True):
        for logits in (False, True):
            outs = (outputs - 0.5) * 8.0 if logits else outputs
            got = jax.block_until_ready(
                dice_loss(outs, targets, per_image=per_image, logits=logits))
            want = _reference_dice_loss(outs, targets, per_image=per_image, logits=logits)
            if not jnp.allclose(got, want, rtol=1e-5, atol=1e-6):
                ok = False
                print("MISMATCH", per_image, logits, float(got), float(want))

    # Unaligned size + tiny blocks + 2 splits: exercises the in-kernel mask,
    # the partially out-of-bounds last block and the split clamp paths
    # (per-image n = 4608 = 36*128, so no pad copy but a ragged last block).
    B2, C2, H2, W2 = 2, 4, 32, 36
    o2 = jax.random.uniform(k_out, (B2, C2, H2, W2), dtype=jnp.float32)
    t2 = (jax.random.uniform(k_tgt, (B2, C2, H2, W2)) > 0.5).astype(jnp.float32)
    for per_image in (False, True):
        for logits in (False, True):
            outs2 = (o2 - 0.5) * 8.0 if logits else o2
            got = jax.block_until_ready(
                dice_loss(outs2, t2, per_image=per_image, logits=logits,
                          block_sublanes=16, num_splits=2))
            want = _reference_dice_loss(outs2, t2, per_image=per_image, logits=logits)
            if not jnp.allclose(got, want, rtol=1e-5, atol=1e-6):
                ok = False
                print("MISMATCH2", per_image, logits, float(got), float(want))

    # Tiny, non-128-multiple flattened size: exercises the pad-copy fallback.
    o3 = jax.random.uniform(k_out, (2, 3, 5, 7), dtype=jnp.float32)
    t3 = (jax.random.uniform(k_tgt, (2, 3, 5, 7)) > 0.5).astype(jnp.float32)
    for per_image in (False, True):
        got = jax.block_until_ready(dice_loss(o3, t3, per_image=per_image))
        want = _reference_dice_loss(o3, t3, per_image=per_image)
        if not jnp.allclose(got, want, rtol=1e-5, atol=1e-6):
            ok = False
            print("MISMATCH3", per_image, float(got), float(want))

    if ok:
        print("KERNEL_OK")
</pallas_src>

<mosaic_0001>
module attributes {stable_mosaic.version = 11 : i64} {
  func.func @kernel(%arg0: i32, %arg1: i32, %arg2: i32, %arg3: memref<1x16x128xf32, #tpu.memory_space<vmem>>, %arg4: memref<1x16x128xf32, #tpu.memory_space<vmem>>, %arg5: memref<1x1x8x128xf32, #tpu.memory_space<vmem>>, %arg6: memref<1x1x8x128xf32, #tpu.memory_space<vmem>>) attributes {dimension_semantics = [#tpu.dimension_semantics<parallel>, #tpu.dimension_semantics<parallel>, #tpu.dimension_semantics<arbitrary>], iteration_bounds = array<i64: 1, 1, 1>, scalar_prefetch = 0 : i64, scratch_operands = 0 : i64, tpu.core_type = #tpu.core_type<tc>, window_params = [{transform_indices = @transform_0, window_bounds = array<i64: 1, 16, 128>}, {transform_indices = @transform_1, window_bounds = array<i64: 1, 16, 128>}, {transform_indices = @transform_2, window_bounds = array<i64: 1, 1, 8, 128>}, {transform_indices = @transform_3, window_bounds = array<i64: 1, 1, 8, 128>}]} {
    %c0_i32 = arith.constant 0 : i32
    %0 = arith.cmpi eq, %arg2, %c0_i32 : i32
    %1 = arith.extui %0 : i1 to i32
    %c0_i32_0 = arith.constant 0 : i32
    %2 = arith.cmpi ne, %1, %c0_i32_0 : i32
    scf.if %2 {
      %cst_23 = arith.constant 0.000000e+00 : f32
      %25 = vector.broadcast %cst_23 : f32 to vector<1x1x8x128xf32>
      %c0_24 = arith.constant 0 : index
      %c0_25 = arith.constant 0 : index
      %c0_26 = arith.constant 0 : index
      %c0_27 = arith.constant 0 : index
      %26 = vector.load %arg5[%c0_24, %c0_25, %c0_26, %c0_27] : memref<1x1x8x128xf32, #tpu.memory_space<vmem>>, vector<1x1x8x128xf32>
      tpu.vector_store %arg5[%c0_24, %c0_25, %c0_26, %c0_27], %25 {strides = array<i32>} : memref<1x1x8x128xf32, #tpu.memory_space<vmem>>, vector<1x1x8x128xf32>,
      %cst_28 = arith.constant 0.000000e+00 : f32
      %27 = vector.broadcast %cst_28 : f32 to vector<1x1x8x128xf32>
      %c0_29 = arith.constant 0 : index
      %c0_30 = arith.constant 0 : index
      %c0_31 = arith.constant 0 : index
      %c0_32 = arith.constant 0 : index
      %28 = vector.load %arg6[%c0_29, %c0_30, %c0_31, %c0_32] : memref<1x1x8x128xf32, #tpu.memory_space<vmem>>, vector<1x1x8x128xf32>
      tpu.vector_store %arg6[%c0_29, %c0_30, %c0_31, %c0_32], %27 {strides = array<i32>} : memref<1x1x8x128xf32, #tpu.memory_space<vmem>>, vector<1x1x8x128xf32>,
    } else {
    }
    %c0 = arith.constant 0 : index
    %c0_1 = arith.constant 0 : index
    %c0_2 = arith.constant 0 : index
    %3 = vector.load %arg3[%c0, %c0_1, %c0_2] : memref<1x16x128xf32, #tpu.memory_space<vmem>>, vector<1x16x128xf32>
    %4 = vector.shape_cast %3 : vector<1x16x128xf32> to vector<16x128xf32>
    %c0_3 = arith.constant 0 : index
    %c0_4 = arith.constant 0 : index
    %c0_5 = arith.constant 0 : index
    %5 = vector.load %arg4[%c0_3, %c0_4, %c0_5] : memref<1x16x128xf32, #tpu.memory_space<vmem>>, vector<1x16x128xf32>
    %6 = vector.shape_cast %5 : vector<1x16x128xf32> to vector<16x128xf32>
    %7 = arith.mulf %4, %6 : vector<16x128xf32>
    %8 = vector.shape_cast %7 : vector<16x128xf32> to vector<2x8x128xf32>
    %cst = arith.constant dense<0.000000e+00> : vector<8x128xf32>
    %9 = vector.multi_reduction <add>, %8, %cst [0] : vector<2x8x128xf32> to vector<8x128xf32>
    %10 = arith.addf %4, %6 : vector<16x128xf32>
    %11 = vector.shape_cast %10 : vector<16x128xf32> to vector<2x8x128xf32>
    %cst_6 = arith.constant dense<0.000000e+00> : vector<8x128xf32>
    %12 = vector.multi_reduction <add>, %11, %cst_6 [0] : vector<2x8x128xf32> to vector<8x128xf32>
    %c0_7 = arith.constant 0 : index
    %c0_8 = arith.constant 0 : index
    %c0_9 = arith.constant 0 : index
    %c0_10 = arith.constant 0 : index
    %13 = vector.load %arg5[%c0_7, %c0_8, %c0_9, %c0_10] : memref<1x1x8x128xf32, #tpu.memory_space<vmem>>, vector<1x1x8x128xf32>
    %14 = vector.shape_cast %13 : vector<1x1x8x128xf32> to vector<8x128xf32>
    %15 = arith.addf %14, %9 : vector<8x128xf32>
    %c0_11 = arith.constant 0 : index
    %c0_12 = arith.constant 0 : index
    %c0_13 = arith.constant 0 : index
    %c0_14 = arith.constant 0 : index
    %16 = vector.load %arg5[%c0_11, %c0_12, %c0_13, %c0_14] : memref<1x1x8x128xf32, #tpu.memory_space<vmem>>, vector<1x1x8x128xf32>
    %17 = vector.shape_cast %16 : vector<1x1x8x128xf32> to vector<8x128xf32>
    %18 = vector.shape_cast %15 : vector<8x128xf32> to vector<1x1x8x128xf32>
    tpu.vector_store %arg5[%c0_11, %c0_12, %c0_13, %c0_14], %18 {strides = array<i32>} : memref<1x1x8x128xf32, #tpu.memory_space<vmem>>, vector<1x1x8x128xf32>,
    %c0_15 = arith.constant 0 : index
    %c0_16 = arith.constant 0 : index
    %c0_17 = arith.constant 0 : index
    %c0_18 = arith.constant 0 : index
    %19 = vector.load %arg6[%c0_15, %c0_16, %c0_17, %c0_18] : memref<1x1x8x128xf32, #tpu.memory_space<vmem>>, vector<1x1x8x128xf32>
    %20 = vector.shape_cast %19 : vector<1x1x8x128xf32> to vector<8x128xf32>
    %21 = arith.addf %20, %12 : vector<8x128xf32>
    %c0_19 = arith.constant 0 : index
    %c0_20 = arith.constant 0 : index
    %c0_21 = arith.constant 0 : index
    %c0_22 = arith.constant 0 : index
    %22 = vector.load %arg6[%c0_19, %c0_20, %c0_21, %c0_22] : memref<1x1x8x128xf32, #tpu.memory_space<vmem>>, vector<1x1x8x128xf32>
    %23 = vector.shape_cast %22 : vector<1x1x8x128xf32> to vector<8x128xf32>
    %24 = vector.shape_cast %21 : vector<8x128xf32> to vector<1x1x8x128xf32>
    tpu.vector_store %arg6[%c0_19, %c0_20, %c0_21, %c0_22], %24 {strides = array<i32>} : memref<1x1x8x128xf32, #tpu.memory_space<vmem>>, vector<1x1x8x128xf32>,
    return
  }
  func.func @transform_0(%arg0: i32, %arg1: i32, %arg2: i32) -> (i32, i32, i32) {
    %c1_i32 = arith.constant 1 : i32
    %0 = arith.muli %arg0, %c1_i32 : i32
    %1 = arith.addi %0, %arg2 : i32
    %c0_i32 = arith.constant 0 : i32
    %2 = arith.minsi %1, %c0_i32 : i32
    %c0_i32_0 = arith.constant 0 : i32
    %c0_i32_1 = arith.constant 0 : i32
    return %arg1, %2, %c0_i32_0 : i32, i32, i32
  }
  func.func @transform_1(%arg0: i32, %arg1: i32, %arg2: i32) -> (i32, i32, i32) {
    %c1_i32 = arith.constant 1 : i32
    %0 = arith.muli %arg0, %c1_i32 : i32
    %1 = arith.addi %0, %arg2 : i32
    %c0_i32 = arith.constant 0 : i32
    %2 = arith.minsi %1, %c0_i32 : i32
    %c0_i32_0 = arith.constant 0 : i32
    %c0_i32_1 = arith.constant 0 : i32
    return %arg1, %2, %c0_i32_0 : i32, i32, i32
  }
  func.func @transform_2(%arg0: i32, %arg1: i32, %arg2: i32) -> (i32, i32, i32, i32) {
    %c0_i32 = arith.constant 0 : i32
    %c0_i32_0 = arith.constant 0 : i32
    %c0_i32_1 = arith.constant 0 : i32
    return %arg0, %arg1, %c0_i32, %c0_i32_0 : i32, i32, i32, i32
  }
  func.func @transform_3(%arg0: i32, %arg1: i32, %arg2: i32) -> (i32, i32, i32, i32) {
    %c0_i32 = arith.constant 0 : i32
    %c0_i32_0 = arith.constant 0 : i32
    %c0_i32_1 = arith.constant 0 : i32
    return %arg0, %arg1, %c0_i32, %c0_i32_0 : i32, i32, i32, i32
  }
}

</mosaic_0001>

<bundles_post_ra>
// kernel: dice_loss.1
= control target key start
LH: loop header
LB: loop body
LE: loop exit
PB: predicated region body
PF: predicated region fallthrough
CT: control target
= control target key end

     0   :  { %s158_s0 = inlined_call_operand.vmem [shape: f32[1,16,128], index: 0, kind: input, shape index: {}]   ;;  %s159_s1 = inlined_call_operand.vmem [shape: f32[1,16,128], index: 1, kind: input, shape index: {}]   ;;  %s160_s2 = inlined_call_operand.vmem [shape: f32[1,1,8,128], index: 2, kind: output, shape index: {0}]   ;;  %s161_s3 = inlined_call_operand.vmem [shape: f32[1,1,8,128], index: 3, kind: output, shape index: {1}]  }
   0x1   :  { %v83_v0 = vld [vmem:[%s158_s0] sm:$0xff]  ;;  %v84_v1 = vld [vmem:[%s158_s0 + $0x8] sm:$0xff] }
   0x2   :  { %v85_v2 = vld [vmem:[%s159_s1] sm:$0xff]  ;;  %v86_v3 = vld [vmem:[%s159_s1 + $0x8] sm:$0xff] }
   0x3   :  { %v87_v4 = vmul.f32 %v85_v2, %v83_v0  ;;  %v90_v5 = vadd.f32 %v85_v2, %v83_v0  ;;  %v88_v6 = vmul.f32 %v86_v3, %v84_v1  ;;  %v91_v7 = vadd.f32 %v86_v3, %v84_v1 }
   0x5   :  { %v89_v8 = vadd.f32 %v88_v6, %v87_v4  ;;  %v92_v9 = vadd.f32 %v91_v7, %v90_v5 }
   0x7   :  { %95 = vst [vmem:[%s160_s2] sm:$0xff] %v89_v8  ;;  %98 = vst [vmem:[%s161_s3] sm:$0xff] %v92_v9 }

</bundles_post_ra>
